<compile_context>
chip_gen: v6e
topology: v6e:2x2x1
jax: 0.10.0
libtpu: 0.0.40
codegen_flags: <defaults>
</compile_context>

<pallas_src>
import jax
import jax.numpy as jnp
from jax.experimental import pallas as pl
from jax.experimental.pallas import tpu as pltpu


HIDDEN = 256


def discriminator_kernel(x_ref, w1_ref, b1_ref, w2_ref, b2_ref, o_ref):
    # x_ref : (K, TILE_B)   activations, batch on the lane axis (bf16)
    # w1_ref: (H, K)        first-layer weight, transposed, resident (bf16)
    # b1_ref: (H, 1)        first-layer bias column (f32)
    # w2_ref: (H, 1)        second-layer weight column (f32)
    # b2_ref: (1, 1) SMEM   second-layer bias scalar (f32)
    # o_ref : (1, TILE_B)   lane-dense sigmoid output (f32)

    # Layer 1 on the MXU: hT = W1 @ xT -> (H, TILE_B), f32 accumulation.
    h = jnp.dot(w1_ref[...], x_ref[...], preferred_element_type=jnp.float32)
    h = jnp.maximum(h + b1_ref[...], 0.0)          # bias broadcasts over lanes

    # Layer 2 (N = 1): VPU multiply + XLU sublane reduction instead of an MXU
    # matmul that would waste 127/128 result lanes.  Result is lane-dense.
    logit = jnp.sum(h * w2_ref[...], axis=0, keepdims=True)      # (1, TILE_B)
    o_ref[...] = jax.nn.sigmoid(logit + b2_ref[0, 0]).astype(o_ref.dtype)


def discriminator_forward(x, w1, b1, w2, b2, *, tile_b=512,
                          matmul_dtype=jnp.bfloat16):
    """x: [B, input_size] f32, w1: [input_size, 256], b1: [1, 256],
    w2: [256, 1], b2: [1, 1]  ->  [B, 1] f32 (sigmoid probabilities)."""
    B, K = x.shape
    H = w1.shape[1]
    assert H == HIDDEN and w2.shape == (HIDDEN, 1)

    # Batch lives on the lane axis -> tile must be a multiple of 128.
    tile_b = max(128, (int(tile_b) // 128) * 128)
    tile_b = min(tile_b, pl.cdiv(B, 128) * 128)      # don't over-tile tiny batches
    b_pad = pl.cdiv(B, tile_b) * tile_b
    grid = (b_pad // tile_b,)

    # Layout plumbing in the wrapper: cast, zero-pad the batch, transpose so
    # the kernel sees (K, B_pad) with batch on lanes.
    x_c = x.astype(matmul_dtype)
    x_p = jnp.pad(x_c, ((0, b_pad - B), (0, 0)))
    xt = x_p.T                                        # (K, B_pad)
    w1t = w1.T.astype(matmul_dtype)                   # (H, K), resident
    b1c = b1.reshape(H, 1).astype(jnp.float32)        # (H, 1)
    w2c = w2.reshape(H, 1).astype(jnp.float32)        # (H, 1)
    b2s = b2.reshape(1, 1).astype(jnp.float32)        # SMEM scalar

    itemsize = jnp.dtype(matmul_dtype).itemsize
    # Rough scoped-VMEM need: double-buffered x tile + resident weights +
    # (H, TILE_B) f32 intermediate + double-buffered output tile (+ padding).
    vmem_need = (2 * K * tile_b * itemsize
                 + H * K * itemsize
                 + 2 * H * 128 * 4            # (H,1) columns pad to (H,128)
                 + H * tile_b * 4
                 + 2 * 8 * tile_b * 4)
    vmem_limit = int(min(max(2 * vmem_need, 32 * 1024 * 1024), 64 * 1024 * 1024))

    out_padded = pl.pallas_call(
        discriminator_kernel,
        out_shape=jax.ShapeDtypeStruct((1, b_pad), jnp.float32),
        grid=grid,
        in_specs=[
            pl.BlockSpec((K, tile_b), lambda i: (0, i)),           # x tile (streamed)
            pl.BlockSpec((H, K), lambda i: (0, 0)),                # w1 (VMEM resident)
            pl.BlockSpec((H, 1), lambda i: (0, 0)),                # b1 (resident)
            pl.BlockSpec((H, 1), lambda i: (0, 0)),                # w2 (resident)
            pl.BlockSpec(memory_space=pltpu.MemorySpace.SMEM),     # b2 scalar
        ],
        out_specs=pl.BlockSpec((1, tile_b), lambda i: (0, i)),     # lane-dense out
        compiler_params=pltpu.CompilerParams(
            dimension_semantics=("parallel",),
            vmem_limit_bytes=vmem_limit,
        ),
        cost_estimate=pl.CostEstimate(
            flops=2 * b_pad * K * H + 6 * b_pad * H,
            transcendentals=b_pad,
            bytes_accessed=(xt.size * itemsize
                            + w1t.size * itemsize
                            + (2 * H + 1) * 4
                            + b_pad * 4),
        ),
    )(xt, w1t, b1c, w2c, b2s)

    # Back to the PyTorch (B, 1) layout; drop batch padding.
    return out_padded[0, :B].reshape(B, 1)


def init_params(key, input_size):
    """Deterministic init mimicking PyTorch's default Linear init
    (uniform(-1/sqrt(fan_in), 1/sqrt(fan_in)))."""
    k1, k2, k3, k4 = jax.random.split(key, 4)
    bound1 = 1.0 / jnp.sqrt(jnp.float32(input_size))
    bound2 = 1.0 / jnp.sqrt(jnp.float32(HIDDEN))
    # Stored as [in_features, out_features] (x @ W == PyTorch x @ W.T).
    w1 = jax.random.uniform(k1, (input_size, HIDDEN), jnp.float32, -bound1, bound1)
    b1 = jax.random.uniform(k2, (1, HIDDEN), jnp.float32, -bound1, bound1)
    w2 = jax.random.uniform(k3, (HIDDEN, 1), jnp.float32, -bound2, bound2)
    b2 = jax.random.uniform(k4, (1, 1), jnp.float32, -bound2, bound2)
    return w1, b1, w2, b2


def _reference(x, w1, b1, w2, b2):
    # Same bf16 rounding of the matmul inputs as the kernel, f32 accumulation.
    xr = x.astype(jnp.bfloat16).astype(jnp.float32)
    w1r = w1.astype(jnp.bfloat16).astype(jnp.float32)
    h = jnp.maximum(
        jnp.dot(xr, w1r, precision=jax.lax.Precision.HIGHEST) + b1, 0.0)
    return jax.nn.sigmoid(
        jnp.dot(h, w2, precision=jax.lax.Precision.HIGHEST) + b2)


if __name__ == "__main__":
    key = jax.random.PRNGKey(0)
    k_x, k_p, k_x2 = jax.random.split(key, 3)

    input_size = 64
    w1, b1, w2, b2 = init_params(k_p, input_size)

    # Small case (single grid step, batch padded 8 -> 128).
    batch = 8
    x = jax.random.normal(k_x, (batch, input_size), dtype=jnp.float32)
    out = jax.block_until_ready(discriminator_forward(x, w1, b1, w2, b2))
    assert out.shape == (batch, 1)
    ref = _reference(x, w1, b1, w2, b2)
    assert jnp.allclose(out, ref, atol=1e-3, rtol=1e-3)

    # Multi-tile case with a non-multiple-of-128 batch (exercises grid + padding).
    batch2 = 300
    x2 = jax.random.normal(k_x2, (batch2, input_size), dtype=jnp.float32)
    out2 = jax.block_until_ready(
        discriminator_forward(x2, w1, b1, w2, b2, tile_b=128))
    assert out2.shape == (batch2, 1)
    ref2 = _reference(x2, w1, b1, w2, b2)
    assert jnp.allclose(out2, ref2, atol=1e-3, rtol=1e-3)

    print("KERNEL_OK")
</pallas_src>

<mosaic_0001>
module attributes {stable_mosaic.version = 11 : i64} {
  func.func @discriminator_kernel(%arg0: i32, %arg1: memref<64x128xbf16, #tpu.memory_space<vmem>>, %arg2: memref<256x64xbf16, #tpu.memory_space<vmem>>, %arg3: memref<256x1xf32, #tpu.memory_space<vmem>>, %arg4: memref<256x1xf32, #tpu.memory_space<vmem>>, %arg5: memref<1x1xf32, #tpu.memory_space<smem>>, %arg6: memref<1x128xf32, #tpu.memory_space<vmem>>) attributes {dimension_semantics = [#tpu.dimension_semantics<parallel>], iteration_bounds = array<i64: 1>, scalar_prefetch = 0 : i64, scratch_operands = 0 : i64, tpu.core_type = #tpu.core_type<tc>, window_params = [{transform_indices = @transform_0, window_bounds = array<i64: 64, 128>}, {pipeline_mode = #tpu.pipeline_mode<synchronous>, transform_indices = @transform_1, window_bounds = array<i64: 256, 64>}, {pipeline_mode = #tpu.pipeline_mode<synchronous>, transform_indices = @transform_2, window_bounds = array<i64: 256, 1>}, {pipeline_mode = #tpu.pipeline_mode<synchronous>, transform_indices = @transform_3, window_bounds = array<i64: 256, 1>}, {transform_indices = @transform_4, window_bounds = array<i64: 1, 1>}, {transform_indices = @transform_5, window_bounds = array<i64: 1, 128>}]} {
    %c0 = arith.constant 0 : index
    %c0_0 = arith.constant 0 : index
    %0 = vector.load %arg2[%c0, %c0_0] : memref<256x64xbf16, #tpu.memory_space<vmem>>, vector<256x64xbf16>
    %c0_1 = arith.constant 0 : index
    %c0_2 = arith.constant 0 : index
    %1 = vector.load %arg1[%c0_1, %c0_2] : memref<64x128xbf16, #tpu.memory_space<vmem>>, vector<64x128xbf16>
    %cst = arith.constant dense<0.000000e+00> : vector<256x128xf32>
    %2 = tpu.matmul %0, %1, %cst {dimension_numbers = #tpu.dot_dimension_numbers<[1], [0], [0], [1], [0, 0, 1, 1], [], []>} : vector<256x64xbf16>, vector<64x128xbf16>, vector<256x128xf32> -> vector<256x128xf32>
    %c0_3 = arith.constant 0 : index
    %c0_4 = arith.constant 0 : index
    %3 = vector.load %arg3[%c0_3, %c0_4] : memref<256x1xf32, #tpu.memory_space<vmem>>, vector<256x1xf32>
    %4 = vector.broadcast %3 : vector<256x1xf32> to vector<256x128xf32>
    %5 = arith.addf %2, %4 : vector<256x128xf32>
    %cst_5 = arith.constant 0.000000e+00 : f32
    %6 = vector.broadcast %cst_5 : f32 to vector<256x128xf32>
    %7 = arith.maximumf %5, %6 : vector<256x128xf32>
    %c0_6 = arith.constant 0 : index
    %c0_7 = arith.constant 0 : index
    %8 = vector.load %arg4[%c0_6, %c0_7] : memref<256x1xf32, #tpu.memory_space<vmem>>, vector<256x1xf32>
    %9 = vector.broadcast %8 : vector<256x1xf32> to vector<256x128xf32>
    %10 = arith.mulf %7, %9 : vector<256x128xf32>
    %cst_8 = arith.constant dense<0.000000e+00> : vector<128xf32>
    %11 = vector.multi_reduction <add>, %10, %cst_8 [0] : vector<256x128xf32> to vector<128xf32>
    %12 = vector.shape_cast %11 : vector<128xf32> to vector<1x128xf32>
    %c0_9 = arith.constant 0 : index
    %c0_10 = arith.constant 0 : index
    %13 = memref.load %arg5[%c0_9, %c0_10] : memref<1x1xf32, #tpu.memory_space<smem>>
    %14 = vector.broadcast %13 : f32 to vector<1x128xf32>
    %15 = arith.addf %12, %14 : vector<1x128xf32>
    %16 = arith.negf %15 : vector<1x128xf32>
    %17 = math.exp %16 : vector<1x128xf32>
    %cst_11 = arith.constant 1.000000e+00 : f32
    %18 = vector.broadcast %cst_11 : f32 to vector<1x128xf32>
    %19 = arith.addf %18, %17 : vector<1x128xf32>
    %20 = arith.divf %18, %19 : vector<1x128xf32>
    %c0_12 = arith.constant 0 : index
    %c0_13 = arith.constant 0 : index
    %21 = vector.load %arg6[%c0_12, %c0_13] : memref<1x128xf32, #tpu.memory_space<vmem>>, vector<1x128xf32>
    tpu.vector_store %arg6[%c0_12, %c0_13], %20 {strides = array<i32>} : memref<1x128xf32, #tpu.memory_space<vmem>>, vector<1x128xf32>,
    return
  }
  func.func @transform_0(%arg0: i32) -> (i32, i32) {
    %c0_i32 = arith.constant 0 : i32
    %c0_i32_0 = arith.constant 0 : i32
    return %c0_i32, %arg0 : i32, i32
  }
  func.func @transform_1(%arg0: i32) -> (i32, i32) {
    %c0_i32 = arith.constant 0 : i32
    %c0_i32_0 = arith.constant 0 : i32
    %c0_i32_1 = arith.constant 0 : i32
    return %c0_i32, %c0_i32_0 : i32, i32
  }
  func.func @transform_2(%arg0: i32) -> (i32, i32) {
    %c0_i32 = arith.constant 0 : i32
    %c0_i32_0 = arith.constant 0 : i32
    %c0_i32_1 = arith.constant 0 : i32
    return %c0_i32, %c0_i32_0 : i32, i32
  }
  func.func @transform_3(%arg0: i32) -> (i32, i32) {
    %c0_i32 = arith.constant 0 : i32
    %c0_i32_0 = arith.constant 0 : i32
    %c0_i32_1 = arith.constant 0 : i32
    return %c0_i32, %c0_i32_0 : i32, i32
  }
  func.func @transform_4(%arg0: i32) -> (i32, i32) {
    %c0_i32 = arith.constant 0 : i32
    %c0_i32_0 = arith.constant 0 : i32
    %c0_i32_1 = arith.constant 0 : i32
    return %c0_i32, %c0_i32_0 : i32, i32
  }
  func.func @transform_5(%arg0: i32) -> (i32, i32) {
    %c0_i32 = arith.constant 0 : i32
    %c0_i32_0 = arith.constant 0 : i32
    return %c0_i32, %arg0 : i32, i32
  }
}

</mosaic_0001>

<bundles_post_ra>
// kernel: tpu_custom_call.1
= control target key start
LH: loop header
LB: loop body
LE: loop exit
PB: predicated region body
PF: predicated region fallthrough
CT: control target
= control target key end

     0   :  { %v1041_v2 = vmov 0   ;;  %vm359_vm0 = vcmask 523264   ;;  %s1494_s0 = inlined_call_operand.vmem [shape: bf16[64,128], index: 0, kind: input, shape index: {}]   ;;  %s1495_s1 = inlined_call_operand.vmem [shape: bf16[256,64], index: 1, kind: input, shape index: {}]   ;;  %s1496_s2 = inlined_call_operand.vmem [shape: f32[256,1], index: 2, kind: input, shape index: {}]   ;;  %s1497_s3 = inlined_call_operand.vmem [shape: f32[256,1], index: 3, kind: input, shape index: {}]   ;;  %s1498_s4 = inlined_call_operand.<no memory space> [shape: f32[1,1], index: 4, kind: input, shape index: {}]   ;;  %s1499_s5 = inlined_call_operand.hbm [shape: f32[1,128], index: 5, kind: output, shape index: {}]  }
   0x1   :  { %v65_v0 = vld [vmem:[%s1496_s2 + $0x10] sm:$0xff]  ;;  %v63_v1 = vld [vmem:[%s1496_s2] sm:$0xff]  ;;  %994 = vset.pattern.permute.xlu1 %v1041_v2  ;;  %993 = vset.pattern.permute.xlu0 %v1041_v2  ;;  %v995_v3 = vld [vmem:[%s1494_s0 + $0x18] sm:$0xff]  }
   0x2   :  { %107 = vperm.xlu1 %994, %v65_v0   ;;  %97 = vperm.xlu0 %993, %v63_v1   ;;  %v66_v4 = vld [vmem:[%s1496_s2 + $0x18] sm:$0xff]  ;;  %v64_v5 = vld [vmem:[%s1496_s2 + $0x8] sm:$0xff]  ;;  %v996_v6 = vld [vmem:[%s1494_s0 + $0x10] sm:$0xff]  }
   0x3   :  { %943 = vmatprep.subr.bf16.mxu0 %v995_v3  ;;  %983 = vmatprep.subr.bf16.mxu1 %v995_v3  ;;  %v997_v7 = vld [vmem:[%s1494_s0 + $0x8] sm:$0xff]   ;;  %v67_v9 = vld [vmem:[%s1496_s2 + $0x20] sm:$0xff]  ;;  %v70_v13 = vld [vmem:[%s1496_s2 + $0x38] sm:$0xff] }
   0x4   :  { %944 = vmatpush3.bf16.msra.mxu0 %v995_v3  ;;  %987 = vmatpush3.bf16.msra.mxu1 %v995_v3  ;;  %v68_v8 = vld [vmem:[%s1496_s2 + $0x28] sm:$0xff]  ;;  %v998_v10 = vld [vmem:[%s1494_s0] sm:$0xff]   ;;  %v69_v14 = vld [vmem:[%s1496_s2 + $0x30] sm:$0xff] }
   0x5   :  { %945 = vmatprep.subr.bf16.mxu0 %v996_v6  ;;  %984 = vmatprep.subr.bf16.mxu1 %v996_v6  ;;  %v999_v11 = vld [vmem:[%s1495_s1] sm:$0xff]   ;;  %v72_v15 = vld [vmem:[%s1496_s2 + $0x48] sm:$0xff]  ;;  %v1003_v19 = vld [vmem:[%s1495_s1 + $0x10] sm:$0xff]  }
   0x6   :  { %112 = vperm.xlu1 %994, %v66_v4   ;;  %102 = vperm.xlu0 %993, %v64_v5   ;;  %v1000_v12 = vld [vmem:[%s1495_s1 + $0x40] sm:$0xff]   ;;  %v1001_v17 = vld [vmem:[%s1495_s1 + $0x8] sm:$0xff]   ;;  %v1004_v20 = vld [vmem:[%s1495_s1 + $0x50] sm:$0xff]  }
   0x7   :  { %951 = vmatprep.mubr.msk.bf16.mxu0 %vm359_vm0, %v999_v11  ;;  %967 = vmatprep.mubr.msk.bf16.mxu1 %vm359_vm0, %v1000_v12  ;;  %v71_v16 = vld [vmem:[%s1496_s2 + $0x40] sm:$0xff]  ;;  %v1002_v18 = vld [vmem:[%s1495_s1 + $0x48] sm:$0xff]   ;;  %v74_v21 = vld [vmem:[%s1496_s2 + $0x58] sm:$0xff] }
   0x8   :  { %946 = vmatpush3.bf16.msra.mxu0 %v996_v6  ;;  %988 = vmatpush3.bf16.msra.mxu1 %v996_v6  ;;  %v73_v22 = vld [vmem:[%s1496_s2 + $0x50] sm:$0xff]  ;;  %v76_v23 = vld [vmem:[%s1496_s2 + $0x68] sm:$0xff]  ;;  %v75_v24 = vld [vmem:[%s1496_s2 + $0x60] sm:$0xff] }
   0x9   :  { %947 = vmatprep.subr.bf16.mxu0 %v997_v7  ;;  %985 = vmatprep.subr.bf16.mxu1 %v997_v7  ;;  %v1005_v25 = vld [vmem:[%s1495_s1 + $0x18] sm:$0xff]   ;;  %v1007_v27 = vld [vmem:[%s1495_s1 + $0x20] sm:$0xff]   ;;  %v77_v30 = vld [vmem:[%s1496_s2 + $0x70] sm:$0xff] }
   0xa   :  { %122 = vperm.xlu1 %994, %v68_v8   ;;  %117 = vperm.xlu0 %993, %v67_v9   ;;  %v1006_v26 = vld [vmem:[%s1495_s1 + $0x58] sm:$0xff]   ;;  %v1008_v28 = vld [vmem:[%s1495_s1 + $0x60] sm:$0xff]   ;;  %v80_v31 = vld [vmem:[%s1496_s2 + $0x88] sm:$0xff] }
   0xb   :  { %v78_v29 = vld [vmem:[%s1496_s2 + $0x78] sm:$0xff]  ;;  %v79_v32 = vld [vmem:[%s1496_s2 + $0x80] sm:$0xff]  ;;  %v1009_v33 = vld [vmem:[%s1495_s1 + $0x28] sm:$0xff]  }
   0xc   :  { %948 = vmatpush3.bf16.msra.mxu0 %v997_v7  ;;  %989 = vmatpush3.bf16.msra.mxu1 %v997_v7  ;;  %v1010_v34 = vld [vmem:[%s1495_s1 + $0x68] sm:$0xff]   ;;  %v1011_v35 = vld [vmem:[%s1495_s1 + $0x30] sm:$0xff]   ;;  %v82_v37 = vld [vmem:[%s1496_s2 + $0x98] sm:$0xff] }
   0xd   :  { %949 = vmatprep.subr.bf16.mxu0 %v998_v10  ;;  %986 = vmatprep.subr.bf16.mxu1 %v998_v10  ;;  %v1012_v36 = vld [vmem:[%s1495_s1 + $0x70] sm:$0xff]   ;;  %v601_v39 = vld [vmem:[%s1497_s3] sm:$0xff]  ;;  %v1013_v41 = vld [vmem:[%s1495_s1 + $0x38] sm:$0xff]  }
   0xe   :  { %132 = vperm.xlu1 %994, %v70_v13   ;;  %127 = vperm.xlu0 %993, %v69_v14   ;;  %v81_v38 = vld [vmem:[%s1496_s2 + $0x90] sm:$0xff]  ;;  %v83_v40 = vld [vmem:[%s1496_s2 + $0xa0] sm:$0xff]  ;;  %v1014_v42 = vld [vmem:[%s1495_s1 + $0x78] sm:$0xff]  }
  0x10   :  { %950 = vmatpush3.bf16.msra.mxu0 %v998_v10  ;;  %990 = vmatpush3.bf16.msra.mxu1 %v998_v10 }
  0x12   :  { %142 = vperm.xlu1 %994, %v72_v15   ;;  %137 = vperm.xlu0 %993, %v71_v16  }
  0x13   :  { %952 = vmatmul.mubr.msk.bf16.vlgmr.msra.gmra.mxu0 %vm359_vm0, %v1001_v17  ;;  %968 = vmatmul.mubr.msk.bf16.vlgmr.msra.gmra.mxu1 %vm359_vm0, %v1002_v18 }
  0x14   :  { %955 = vmatprep.mubr.msk.bf16.mxu0 %vm359_vm0, %v1003_v19  ;;  %971 = vmatprep.mubr.msk.bf16.mxu1 %vm359_vm0, %v1004_v20 }
  0x16   :  { %152 = vperm.xlu1 %994, %v74_v21   ;;  %147 = vperm.xlu0 %993, %v73_v22  }
  0x1a   :  { %162 = vperm.xlu1 %994, %v76_v23   ;;  %157 = vperm.xlu0 %993, %v75_v24  }
  0x1b   :  { %956 = vmatmul.mubr.msk.bf16.gmra.mxu0 %vm359_vm0, %v1005_v25  ;;  %972 = vmatmul.mubr.msk.bf16.gmra.mxu1 %vm359_vm0, %v1006_v26 }
  0x1c   :  { %959 = vmatprep.mubr.msk.bf16.mxu0 %vm359_vm0, %v1007_v27  ;;  %975 = vmatprep.mubr.msk.bf16.mxu1 %vm359_vm0, %v1008_v28 }
  0x1e   :  { %172 = vperm.xlu1 %994, %v78_v29   ;;  %167 = vperm.xlu0 %993, %v77_v30  }
  0x22   :  { %182 = vperm.xlu1 %994, %v80_v31   ;;  %177 = vperm.xlu0 %993, %v79_v32  }
  0x23   :  { %960 = vmatmul.mubr.msk.bf16.gmra.mxu0 %vm359_vm0, %v1009_v33  ;;  %976 = vmatmul.mubr.msk.bf16.gmra.mxu1 %vm359_vm0, %v1010_v34 }
  0x24   :  { %963 = vmatprep.mubr.msk.bf16.mxu0 %vm359_vm0, %v1011_v35  ;;  %979 = vmatprep.mubr.msk.bf16.mxu1 %vm359_vm0, %v1012_v36 }
  0x26   :  { %192 = vperm.xlu1 %994, %v82_v37   ;;  %187 = vperm.xlu0 %993, %v81_v38  }
  0x27   :  { %11 = vsyncpa [#allocation4], 0  ;;  %v603_v43 = vld [vmem:[%s1497_s3 + $0x10] sm:$0xff]  ;;  %v602_v44 = vld [vmem:[%s1497_s3 + $0x8] sm:$0xff]  ;;  %s1042_s27 = smov [#allocation3]  }
  0x28   :  { %v605_v45 = vld [vmem:[%s1497_s3 + $0x20] sm:$0xff]  ;;  %v604_v46 = vld [vmem:[%s1497_s3 + $0x18] sm:$0xff]  ;;  %v607_v47 = vld [vmem:[%s1497_s3 + $0x30] sm:$0xff]  ;;  %s878_s28 = sshll.u32 %s1042_s27, 4  ;;  %s879_s28 = int_to_ptr.vmem [resolvable:$true] %s878_s28 }
  0x29   :  { %v606_v48 = vld [vmem:[%s1497_s3 + $0x28] sm:$0xff]  ;;  %v609_v49 = vld [vmem:[%s1497_s3 + $0x40] sm:$0xff]  ;;  %v608_v50 = vld [vmem:[%s1497_s3 + $0x38] sm:$0xff]  ;;  %s1019_s29 = scalar_lea.vmem %s879_s28, 16  ;;  %s1023_s1 = scalar_lea.vmem %s879_s28, 32 }
  0x2a   :  { %635 = vperm.xlu1 %994, %v601_v39   ;;  %197 = vperm.xlu0 %993, %v83_v40   ;;  %v611_v51 = vld [vmem:[%s1497_s3 + $0x50] sm:$0xff]  ;;  %v610_v52 = vld [vmem:[%s1497_s3 + $0x48] sm:$0xff]  ;;  %v613_v53 = vld [vmem:[%s1497_s3 + $0x60] sm:$0xff]  ;;  %p1020_p0 = scmp.ne.s32.totalorder %s879_s28, %s1019_s29  ;;  %p1024_p1 = scmp.lt.s32.totalorder %s879_s28, %s879_s28 }
  0x2b   :  { %964 = vmatmul.mubr.msk.bf16.gmra.mxu0 %vm359_vm0, %v1013_v41  ;;  %980 = vmatmul.mubr.msk.bf16.gmra.mxu1 %vm359_vm0, %v1014_v42  ;;  %v612_v54 = vld [vmem:[%s1497_s3 + $0x58] sm:$0xff]  ;;  %v615_v55 = vld [vmem:[%s1497_s3 + $0x70] sm:$0xff]  ;;  %v614_v56 = vld [vmem:[%s1497_s3 + $0x68] sm:$0xff]  ;;  %p1025_p2 = scmp.lt.s32.totalorder %s1023_s1, %s1019_s29 }
  0x2c   :  { %v617_v57 = vld [vmem:[%s1497_s3 + $0x80] sm:$0xff]  ;;  %v616_v58 = vld [vmem:[%s1497_s3 + $0x78] sm:$0xff]  ;;  %v619_v59 = vld [vmem:[%s1497_s3 + $0x90] sm:$0xff] }
  0x2d   :  { %v618_v60 = vld [vmem:[%s1497_s3 + $0x88] sm:$0xff]  ;;  %v620_v61 = vld [vmem:[%s1497_s3 + $0x98] sm:$0xff]  ;;  %v621_v63 = vld [vmem:[%s1497_s3 + $0xa0] sm:$0xff]  ;;  %p1026_p3 = por %p1025_p2, %p1024_p1 }
  0x2e   :  { %645 = vperm.xlu1 %994, %v603_v43   ;;  %640 = vperm.xlu0 %993, %v602_v44   ;;  %v84_v62 = vld [vmem:[%s1496_s2 + $0xa8] sm:$0xff]  ;;  %v85_v0 = vld [vmem:[%s1496_s2 + $0xb0] sm:$0xff]  ;;  %v86_v2 = vld [vmem:[%s1496_s2 + $0xb8] sm:$0xff] }
  0x2f   :  { %v622_v1 = vld [vmem:[%s1497_s3 + $0xa8] sm:$0xff]  ;;  %v623_v3 = vld [vmem:[%s1497_s3 + $0xb0] sm:$0xff]  ;;  %v87_v4 = vld [vmem:[%s1496_s2 + $0xc0] sm:$0xff]  ;;  %p1027_p4 = pnand %p1026_p3, %p1020_p0 }
  0x30   :  { %v624_v5 = vld [vmem:[%s1497_s3 + $0xb8] sm:$0xff]  ;;  %v88_v6 = vld [vmem:[%s1496_s2 + $0xc8] sm:$0xff]  ;;  %v625_v7 = vld [vmem:[%s1497_s3 + $0xc0] sm:$0xff] }
  0x31   :  { %v89_v8 = vld [vmem:[%s1496_s2 + $0xd0] sm:$0xff]  ;;  %v626_v9 = vld [vmem:[%s1497_s3 + $0xc8] sm:$0xff]  ;;  %v90_v10 = vld [vmem:[%s1496_s2 + $0xd8] sm:$0xff] }
  0x32   :  { %655 = vperm.xlu1 %994, %v605_v45   ;;  %650 = vperm.xlu0 %993, %v604_v46   ;;  %v627_v11 = vld [vmem:[%s1497_s3 + $0xd0] sm:$0xff]  ;;  %v91_v12 = vld [vmem:[%s1496_s2 + $0xe0] sm:$0xff]  ;;  %v628_v13 = vld [vmem:[%s1497_s3 + $0xd8] sm:$0xff] }
  0x33   :  { %v92_v14 = vld [vmem:[%s1496_s2 + $0xe8] sm:$0xff]  ;;  %v629_v15 = vld [vmem:[%s1497_s3 + $0xe0] sm:$0xff]  ;;  %v93_v16 = vld [vmem:[%s1496_s2 + $0xf0] sm:$0xff] }
  0x34   :  { %v630_v17 = vld [vmem:[%s1497_s3 + $0xe8] sm:$0xff]  ;;  %v94_v18 = vld [vmem:[%s1496_s2 + $0xf8] sm:$0xff]  ;;  %v631_v20 = vld [vmem:[%s1497_s3 + $0xf0] sm:$0xff] }
  0x35   :  { %v632_v19 = vld [vmem:[%s1497_s3 + $0xf8] sm:$0xff] }
  0x36   :  { %665 = vperm.xlu1 %994, %v607_v47   ;;  %660 = vperm.xlu0 %993, %v606_v48  }
  0x3a   :  { %675 = vperm.xlu1 %994, %v609_v49   ;;  %670 = vperm.xlu0 %993, %v608_v50  }
  0x3e   :  { %685 = vperm.xlu1 %994, %v611_v51   ;;  %680 = vperm.xlu0 %993, %v610_v52  }
  0x42   :  { %695 = vperm.xlu1 %994, %v613_v53   ;;  %690 = vperm.xlu0 %993, %v612_v54  }
  0x46   :  { %705 = vperm.xlu1 %994, %v615_v55   ;;  %700 = vperm.xlu0 %993, %v614_v56  }
  0x4a   :  { %715 = vperm.xlu1 %994, %v617_v57   ;;  %710 = vperm.xlu0 %993, %v616_v58  }
  0x4e   :  { %725 = vperm.xlu1 %994, %v619_v59   ;;  %720 = vperm.xlu0 %993, %v618_v60  }
  0x52   :  { %730 = vperm.xlu1 %994, %v620_v61   ;;  %202 = vperm.xlu0 %993, %v84_v62  }
  0x56   :  { %735 = vperm.xlu1 %994, %v621_v63   ;;  %207 = vperm.xlu0 %993, %v85_v0  }
  0x5a   :  { %740 = vperm.xlu1 %994, %v622_v1   ;;  %212 = vperm.xlu0 %993, %v86_v2  }
  0x5e   :  { %745 = vperm.xlu1 %994, %v623_v3   ;;  %217 = vperm.xlu0 %993, %v87_v4  }
  0x62   :  { %750 = vperm.xlu1 %994, %v624_v5   ;;  %222 = vperm.xlu0 %993, %v88_v6  }
  0x66   :  { %755 = vperm.xlu1 %994, %v625_v7   ;;  %227 = vperm.xlu0 %993, %v89_v8  }
  0x6a   :  { %760 = vperm.xlu1 %994, %v626_v9   ;;  %232 = vperm.xlu0 %993, %v90_v10  }
  0x6e   :  { %765 = vperm.xlu1 %994, %v627_v11   ;;  %237 = vperm.xlu0 %993, %v91_v12  }
  0x72   :  { %770 = vperm.xlu1 %994, %v628_v13   ;;  %242 = vperm.xlu0 %993, %v92_v14  }
  0x76   :  { %775 = vperm.xlu1 %994, %v629_v15   ;;  %247 = vperm.xlu0 %993, %v93_v16  }
  0x7a   :  { %780 = vperm.xlu1 %994, %v630_v17   ;;  %252 = vperm.xlu0 %993, %v94_v18  }
  0x7d   :  { %v108_v21 = vpop.permute.xlu1 %107  ;;  %v98_v22 = vpop.permute.xlu0 %97 }
  0x7e   :  { %790 = vperm.xlu1 %994, %v632_v19   ;;  %785 = vperm.xlu0 %993, %v631_v20  }
  0x81   :  { %v113_v23 = vpop.permute.xlu1 %112  ;;  %v103_v24 = vpop.permute.xlu0 %102 }
  0x85   :  { %v1341_v25 = vpop.permute.xlu1 %122  ;;  %v118_v26 = vpop.permute.xlu0 %117 }
  0x89   :  { %v1343_v27 = vpop.permute.xlu1 %132  ;;  %v1345_v28 = vpop.permute.xlu0 %127 }
  0x8d   :  { %v1347_v29 = vpop.permute.xlu1 %142  ;;  %v1349_v30 = vpop.permute.xlu0 %137 }
  0x91   :  { %v1351_v31 = vpop.permute.xlu1 %152  ;;  %v1353_v32 = vpop.permute.xlu0 %147 }
  0x95   :  { %v1355_v33 = vpop.permute.xlu1 %162  ;;  %v1357_v34 = vpop.permute.xlu0 %157 }
  0x99   :  { %v1359_v35 = vpop.permute.xlu1 %172  ;;  %v1361_v36 = vpop.permute.xlu0 %167 }
  0x9d   :  { %v1363_v37 = vpop.permute.xlu1 %182  ;;  %v1365_v38 = vpop.permute.xlu0 %177 }
  0xa1   :  { %v1367_v39 = vpop.permute.xlu1 %192  ;;  %v1369_v40 = vpop.permute.xlu0 %187 }
  0xa5   :  { %v636_v41 = vpop.permute.xlu1 %635  ;;  %v1371_v42 = vpop.permute.xlu0 %197 }
  0xa9   :  { %v646_v43 = vpop.permute.xlu1 %645  ;;  %v641_v44 = vpop.permute.xlu0 %640 }
  0xad   :  { %v656_v45 = vpop.permute.xlu1 %655  ;;  %v651_v46 = vpop.permute.xlu0 %650 }
  0xb1   :  { %v1373_v47 = vpop.permute.xlu1 %665  ;;  %v661_v48 = vpop.permute.xlu0 %660 }
  0xb5   :  { %v1375_v49 = vpop.permute.xlu1 %675  ;;  %v1377_v50 = vpop.permute.xlu0 %670 }
  0xb9   :  { %v1379_v51 = vpop.permute.xlu1 %685  ;;  %v1381_v52 = vpop.permute.xlu0 %680 }
  0xbd   :  { %v1383_v53 = vpop.permute.xlu0 %690  ;;  %v1385_v54 = vpop.permute.xlu1 %695 }
  0xc1   :  { %v1387_v55 = vpop.permute.xlu0 %700  ;;  %v1389_v56 = vpop.permute.xlu1 %705 }
  0xc5   :  { %v1391_v57 = vpop.permute.xlu0 %710  ;;  %v1393_v58 = vpop.permute.xlu1 %715 }
  0xc9   :  { %v1395_v59 = vpop.permute.xlu0 %720  ;;  %v1397_v60 = vpop.permute.xlu1 %725 }
  0xcd   :  { %v1401_v63 = vpop.permute.xlu0 %202  ;;  %v1405_v2 = vpop.permute.xlu1 %730 }
  0xd1   :  { %v1409_v8 = vpop.permute.xlu0 %207  ;;  %v1411_v13 = vpop.permute.xlu1 %735 }
  0xd2   :  { %1500 = vst [vmem:[#allocation6_spill] sm:$0xff] %v1411_v13 }
  0xd3   :  { %v953_v61 = vpop.f32.mrf.mxu0  ;;  %v1399_v62 = vpop.f32.mrf.mxu1 }
  0xd4   :  { %v451_v6 = vadd.f32 %v953_v61, %v108_v21 }
  0xd5   :  { %v442_v0 = vpop.f32.mrf.mxu0  ;;  %v1403_v1 = vpop.f32.mrf.mxu1 }
  0xd6   :  { %v443_v3 = vadd.f32 %v442_v0, %v98_v22  ;;  %v571_v15 = vmax.f32 %v451_v6, 0.0  ;;  %v1415_v21 = vpop.permute.xlu0 %212  ;;  %v1420_v13 = vpop.permute.xlu1 %740 }
  0xd7   :  { %v954_v4 = vpop.f32.mrf.mxu0  ;;  %v1407_v5 = vpop.f32.mrf.mxu1 }
  0xd8   :  { %v569_v9 = vmax.f32 %v443_v3, 0.0  ;;  %v454_v10 = vadd.f32 %v954_v4, %v113_v23  ;;  %v795_v3 = vmul.f32 %v646_v43, %v571_v15 }
  0xd9   :  { %v445_v7 = vpop.f32.mrf.mxu0  ;;  %v1413_v14 = vpop.f32.mrf.mxu1 }
  0xda   :  { %v446_v11 = vadd.f32 %v445_v7, %v103_v24  ;;  %v793_v19 = vmul.f32 %v636_v41, %v569_v9  ;;  %v572_v20 = vmax.f32 %v454_v10, 0.0 }
  0xdb   :  { %v957_v12 = vpop.f32.mrf.mxu0  ;;  %v1417_v61 = vpop.f32.mrf.mxu1 }
  0xdc   :  { %v570_v16 = vmax.f32 %v446_v11, 0.0  ;;  %v467_v24 = vadd.f32 %v957_v12, %v1345_v28  ;;  %v796_v11 = vmul.f32 %v651_v46, %v572_v20  ;;  %v1429_v46 = vpop.permute.xlu1 %745 }
  0xdd   :  { %v458_v17 = vpop.f32.mrf.mxu0  ;;  %v1424_v9 = vpop.f32.mrf.mxu1 }
  0xde   :  { %v459_v18 = vadd.f32 %v458_v17, %v118_v26  ;;  %v794_v22 = vmul.f32 %v641_v44, %v570_v16  ;;  %v575_v16 = vmax.f32 %v467_v24, 0.0 }
  0xdf   :  { %v958_v0 = vpop.f32.mrf.mxu0  ;;  %v1431_v20 = vpop.f32.mrf.mxu1 }
  0xe0   :  { %v825_v23 = vadd.f32 %v794_v22, %v793_v19  ;;  %v573_v4 = vmax.f32 %v459_v18, 0.0  ;;  %v470_v41 = vadd.f32 %v958_v0, %v1343_v27  ;;  %v1426_v19 = vpop.permute.xlu0 %217  ;;  %v799_v27 = vmul.f32 %v1373_v47, %v575_v16 }
  0xe1   :  { %v461_v7 = vpop.f32.mrf.mxu0 }
  0xe2   :  { %v462_v6 = vadd.f32 %v461_v7, %v1341_v25  ;;  %v826_v26 = vadd.f32 %v825_v23, %v795_v3  ;;  %v797_v17 = vmul.f32 %v656_v45, %v573_v4  ;;  %v576_v18 = vmax.f32 %v470_v41, 0.0 }
  0xe3   :  { %v961_v44 = vpop.f32.mrf.mxu0 }
  0xe4   :  { %v574_v10 = vmax.f32 %v462_v6, 0.0  ;;  %v827_v43 = vadd.f32 %v826_v26, %v796_v11  ;;  %v483_v3 = vadd.f32 %v961_v44, %v1353_v32  ;;  %v1438_v6 = vpop.permute.xlu0 %222  ;;  %v525_v11 = vpop.f32.mrf.mxu1 }
  0xe5   :  { %v474_v15 = vpop.f32.mrf.mxu0  ;;  %v1441_v32 = vpop.permute.xlu1 %750 }
  0xe6   :  { %v798_v28 = vmul.f32 %v661_v48, %v574_v10  ;;  %v828_v12 = vadd.f32 %v827_v43, %v797_v17  ;;  %v475_v22 = vadd.f32 %v474_v15, %v1349_v30  ;;  %v800_v48 = vmul.f32 %v1377_v50, %v576_v18 }
  0xe7   :  { %v962_v25 = vpop.f32.mrf.mxu0  ;;  %v579_v41 = vmax.f32 %v483_v3, 0.0 }
  0xe8   :  { %v829_v0 = vadd.f32 %v828_v12, %v798_v28  ;;  %v577_v45 = vmax.f32 %v475_v22, 0.0  ;;  %v486_v7 = vadd.f32 %v962_v25, %v1351_v31  ;;  %v1445_v31 = vpop.f32.mrf.mxu1  ;;  %v1449_v22 = vpop.permute.xlu0 %227 }
  0xe9   :  { %v477_v23 = vpop.f32.mrf.mxu0  ;;  %v803_v15 = vmul.f32 %v1379_v51, %v579_v41  ;;  %v507_v51 = vadd.f32 %v1403_v1, %v1365_v38 }
  0xea   :  { %v478_v24 = vadd.f32 %v477_v23, %v1347_v29  ;;  %v830_v4 = vadd.f32 %v829_v0, %v799_v27  ;;  %v801_v47 = vmul.f32 %v1375_v49, %v577_v45  ;;  %v580_v17 = vmax.f32 %v486_v7, 0.0  ;;  %v1454_v0 = vpop.permute.xlu1 %755  ;;  %v538_v3 = vpop.f32.mrf.mxu1 }
  0xeb   :  { %v965_v30 = vpop.f32.mrf.mxu0 }
  0xec   :  { %v578_v26 = vmax.f32 %v478_v24, 0.0  ;;  %v831_v10 = vadd.f32 %v830_v4, %v800_v48  ;;  %v499_v12 = vadd.f32 %v965_v30, %v1361_v36  ;;  %v233_v7 = vpop.permute.xlu0 %232  ;;  %v515_v30 = vadd.f32 %v1399_v62, %v1369_v40 }
  0xed   :  { %v490_v16 = vpop.f32.mrf.mxu0 }
  0xee   :  { %v802_v44 = vmul.f32 %v1381_v52, %v578_v26  ;;  %v491_v29 = vadd.f32 %v490_v16, %v1357_v34  ;;  %v832_v50 = vadd.f32 %v831_v10, %v801_v47  ;;  %v804_v52 = vmul.f32 %v1383_v53, %v580_v17  ;;  %v761_v1 = vpop.permute.xlu1 %760 }
  0xef   :  { %v966_v43 = vpop.f32.mrf.mxu0  ;;  %v583_v23 = vmax.f32 %v499_v12, 0.0  ;;  %v585_v26 = vmax.f32 %v507_v51, 0.0 }
  0xf0   :  { %v833_v28 = vadd.f32 %v832_v50, %v802_v44  ;;  %v581_v18 = vmax.f32 %v491_v29, 0.0  ;;  %v502_v34 = vadd.f32 %v966_v43, %v1359_v35  ;;  %v978_v35 = vpop.f32.mrf.mxu1  ;;  %v523_v44 = vadd.f32 %v1424_v9, %v1371_v42  ;;  %v238_v62 = vpop.permute.xlu0 %237 }
  0xf1   :  { %v493_v49 = vpop.f32.mrf.mxu0  ;;  %v807_v41 = vmul.f32 %v1389_v56, %v583_v23  ;;  %v809_v16 = vmul.f32 %v1393_v58, %v585_v26  ;;  %v526_v50 = vadd.f32 %v525_v11, %v1401_v63  ;;  %v531_v43 = vadd.f32 %v1417_v61, %v1409_v8  ;;  %v1501_v11 = vld [vmem:[#allocation6_spill] sm:$0xff] }
  0xf2   :  { %v494_v25 = vadd.f32 %v493_v49, %v1355_v33  ;;  %v834_v27 = vadd.f32 %v833_v28, %v803_v15  ;;  %v805_v36 = vmul.f32 %v1385_v54, %v581_v18  ;;  %v510_v33 = vadd.f32 %v1413_v14, %v1363_v37  ;;  %v541_v37 = vpop.f32.mrf.mxu1 }
  0xf3   :  { %v584_v4 = vmax.f32 %v502_v34, 0.0  ;;  %v518_v54 = vadd.f32 %v1407_v5, %v1367_v39  ;;  %v587_v14 = vmax.f32 %v515_v30, 0.0  ;;  %v766_v39 = vpop.permute.xlu1 %765  ;;  %v589_v15 = vmax.f32 %v523_v44, 0.0 }
  0xf4   :  { %v582_v45 = vmax.f32 %v494_v25, 0.0  ;;  %v835_v24 = vadd.f32 %v834_v27, %v804_v52  ;;  %v586_v47 = vmax.f32 %v510_v33, 0.0  ;;  %v981_v5 = vpop.f32.mrf.mxu1  ;;  %v534_v42 = vadd.f32 %v1431_v20, %v1415_v21 }
  0xf5   :  { %v588_v29 = vmax.f32 %v518_v54, 0.0  ;;  %v590_v9 = vmax.f32 %v526_v50, 0.0  ;;  %v591_v63 = vmax.f32 %v531_v43, 0.0  ;;  %v813_v49 = vmul.f32 %v1501_v11, %v589_v15 }
  0xf6   :  { %v806_v48 = vmul.f32 %v1387_v55, %v582_v45  ;;  %v836_v53 = vadd.f32 %v835_v24, %v805_v36  ;;  %v808_v55 = vmul.f32 %v1391_v57, %v584_v4  ;;  %v810_v56 = vmul.f32 %v1395_v59, %v586_v47  ;;  %v243_v59 = vpop.permute.xlu0 %242  ;;  %v554_v18 = vpop.f32.mrf.mxu1 }
  0xf7   :  { %v811_v57 = vmul.f32 %v1397_v60, %v587_v14  ;;  %v812_v28 = vmul.f32 %v1405_v2, %v588_v29  ;;  %v539_v25 = vadd.f32 %v538_v3, %v1426_v19  ;;  %v771_v52 = vpop.permute.xlu1 %770  ;;  %v592_v27 = vmax.f32 %v534_v42, 0.0 }
  0xf8   :  { %v837_v38 = vadd.f32 %v836_v53, %v806_v48  ;;  %v814_v8 = vmul.f32 %v1420_v13, %v590_v9  ;;  %v542_v61 = vadd.f32 %v541_v37, %v1438_v6  ;;  %v982_v34 = vpop.f32.mrf.mxu1  ;;  %v815_v21 = vmul.f32 %v1429_v46, %v591_v63 }
  0xf9   :  { %v593_v20 = vmax.f32 %v539_v25, 0.0  ;;  %v816_v23 = vmul.f32 %v1441_v32, %v592_v27  ;;  %v547_v36 = vadd.f32 %v1445_v31, %v1449_v22  ;;  %v550_v24 = vadd.f32 %v978_v35, %v233_v7 }
  0xfa   :  { %v838_v10 = vadd.f32 %v837_v38, %v807_v41  ;;  %v248_v51 = vpop.permute.xlu0 %247  ;;  %v594_v19 = vmax.f32 %v542_v61, 0.0  ;;  %v557_v33 = vpop.f32.mrf.mxu1  ;;  %v555_v6 = vadd.f32 %v554_v18, %v238_v62 }
  0xfb   :  { %v776_v48 = vpop.permute.xlu1 %775  ;;  %v817_v13 = vmul.f32 %v1454_v0, %v593_v20  ;;  %v595_v4 = vmax.f32 %v547_v36, 0.0  ;;  %v558_v46 = vadd.f32 %v557_v33, %v243_v59  ;;  %v596_v41 = vmax.f32 %v550_v24, 0.0 }
  0xfc   :  { %v839_v40 = vadd.f32 %v838_v10, %v808_v55  ;;  %v818_v30 = vmul.f32 %v761_v1, %v594_v19  ;;  %v597_v32 = vmax.f32 %v555_v6, 0.0  ;;  %v563_v22 = vadd.f32 %v981_v5, %v248_v51 }
  0xfd   :  { %v819_v54 = vmul.f32 %v766_v39, %v595_v4  ;;  %v820_v55 = vmul.f32 %v771_v52, %v596_v41  ;;  %v598_v10 = vmax.f32 %v558_v46, 0.0 }
  0xfe   :  { %v840_v17 = vadd.f32 %v839_v40, %v809_v16  ;;  %v253_v38 = vpop.permute.xlu0 %252  ;;  %v821_v37 = vmul.f32 %v776_v48, %v597_v32  ;;  %v599_v16 = vmax.f32 %v563_v22, 0.0 }
  0xff   :  { %v781_v31 = vpop.permute.xlu1 %780  ;;  %v566_v35 = vadd.f32 %v982_v34, %v253_v38 }
 0x100   :  { %v841_v58 = vadd.f32 %v840_v17, %v810_v56  ;;  %v822_v44 = vmul.f32 %v781_v31, %v598_v10 }
 0x101   :  { %v600_v1 = vmax.f32 %v566_v35, 0.0 }
 0x102   :  { %v842_v12 = vadd.f32 %v841_v58, %v811_v57  ;;  %v786_v0 = vpop.permute.xlu0 %785 }
 0x103   :  { %v791_v62 = vpop.permute.xlu1 %790  ;;  %v823_v56 = vmul.f32 %v786_v0, %v599_v16 }
 0x104   :  { %v843_v60 = vadd.f32 %v842_v12, %v812_v28  ;;  %v824_v50 = vmul.f32 %v791_v62, %v600_v1  ;;  %v863_v28 = vstv %s1498_s4 }
 0x106   :  { %v844_v2 = vadd.f32 %v843_v60, %v813_v49 }
 0x108   :  { %v845_v45 = vadd.f32 %v844_v2, %v814_v8 }
 0x10a   :  { %v846_v3 = vadd.f32 %v845_v45, %v815_v21 }
 0x10c   :  { %v847_v53 = vadd.f32 %v846_v3, %v816_v23 }
 0x10e   :  { %v848_v26 = vadd.f32 %v847_v53, %v817_v13 }
 0x110   :  { %v849_v47 = vadd.f32 %v848_v26, %v818_v30 }
 0x112   :  { %v850_v7 = vadd.f32 %v849_v47, %v819_v54 }
 0x114   :  { %v851_v14 = vadd.f32 %v850_v7, %v820_v55 }
 0x116   :  { %v852_v40 = vadd.f32 %v851_v14, %v821_v37 }
 0x118   :  { %v853_v29 = vadd.f32 %v852_v40, %v822_v44 }
 0x11a   :  { %v854_v17 = vadd.f32 %v853_v29, %v823_v56 }
 0x11c   :  { %v855_v39 = vadd.f32 %v854_v17, %v824_v50 }
 0x11e   :  { %v856_v57 = vrot.slane %v855_v39, 4 }
 0x120   :  { %v857_v43 = vadd.f32 %v856_v57, %v855_v39 }
 0x122   :  { %v858_v15 = vrot.slane %v857_v43, 2 }
 0x124   :  { %v859_v5 = vadd.f32 %v858_v15, %v857_v43 }
 0x126   :  { %v860_v58 = vrot.slane %v859_v5, 1 }
 0x128   :  { %v861_v42 = vadd.f32 %v860_v58, %v859_v5 }
 0x12a   :  { %v864_v9 = vadd.f32 %v863_v28, %v861_v42 }
 0x12c   :  { %v922_v12 = vmul.f32 -1.442695, %v864_v9 }
 0x12e   :  { %1015 = vpow2.f32 %v922_v12 }
 0x13b   :  { %v1016_v59 = vpop.eup %1015 }
 0x13c   :  { %v868_v18 = vadd.f32 1.0, %v1016_v59 }
 0x13e   :  { %1017 = vrcp.f32 %v868_v18 }
 0x14b   :  { %v1018_v63 = vpop.eup %1017 }
 0x14c   :  { %871 = vst [vmem:[#allocation3] sm:$0x1] %v1018_v63 }
 0x14d   :  { %1030 = shalt.err (!%p1027_p4)
}
 0x14e   :  { %881 = dma.vmem_to_hbm [thread:$0]  %s879_s28, 16, %s1499_s5, [#allocation4]  }
 0x14f   :  { %1039 = dma.done.wait [#allocation4], 16  }
 0x150   :  { %1040 = vsyncadd [#allocation4], 4294967280 }
 0x151   :  { %885 = vsyncpa [#allocation4], 1 }

</bundles_post_ra>
